<compile_context>
chip_gen: v7x
topology: tpu7x:2x2x1
jax: 0.10.0
libtpu: 0.0.40
codegen_flags: <defaults>
</compile_context>

<pallas_src>
import jax
import jax.numpy as jnp
from jax.experimental import pallas as pl
from jax.experimental.pallas import tpu as pltpu

# ---- model hyper-params (small, consistent with the module) ----------------
N_HEAD = 2
D_MODEL = 32
D_HEAD = 16
D_INNER = 64
QLEN = 8
BSZ = 2
HD = N_HEAD * D_HEAD            # 32
BQ = BSZ * QLEN                 # 16
RLEN = QLEN                     # mems=None path
SCALE = 1.0 / (D_HEAD ** 0.5)   # 0.25 -> exact power of two, folded into weights
LN_EPS = 1e-5
NEG_BIG = -1e30                 # large-but-finite additive mask bias


# =============================================================================
# In-kernel helpers
# =============================================================================
def _layer_norm(x, g, b):
    mu = jnp.mean(x, axis=-1, keepdims=True)
    var = jnp.mean((x - mu) ** 2, axis=-1, keepdims=True)
    return (x - mu) * jax.lax.rsqrt(var + LN_EPS) * g + b


# =============================================================================
# Fused decoder-layer kernel (single program, everything resident in VMEM)
# =============================================================================
def decoder_layer_kernel(slab_ref, maskb_ref, wqkvr_ref, wo_ref, w1_ref, w2_ref,
                         pp_ref, out_ref):
    f32 = jnp.float32
    slab = slab_ref[...]                       # (BQ+RLEN, D_MODEL) = [x batch-major ; r]
    pp = pp_ref[...]                           # (8, 128) packed small params

    ln1_g = pp[0:1, 0:32];  ln1_b = pp[0:1, 32:64]
    ln2_g = pp[0:1, 64:96]; ln2_b = pp[0:1, 96:128]
    ff_b1 = pp[1:2, 0:64];  ff_b2 = pp[1:2, 64:96]
    rwbS  = pp[2:3, 0:HD];  rrbS  = pp[2:3, HD:2 * HD]          # pre-scaled biases

    # ---- one packed projection:  [x; r] @ [Wq^T*S | Wk^T | Wv^T | Wr^T] -> (24, 128)
    proj = jnp.dot(slab, wqkvr_ref[...], preferred_element_type=f32)
    base_q = proj[0:BQ, 0:HD]                                   # scaled q, batch-major rows
    k      = proj[0:BQ, HD:2 * HD]
    v      = proj[0:BQ, 2 * HD:3 * HD]
    rk     = proj[BQ:BQ + RLEN, 3 * HD:4 * HD]                  # shared over batch
    qw = base_q + rwbS                                          # scale*(q + r_w_bias)
    qr = base_q + rrbS                                          # scale*(q + r_r_bias)

    # ---- ONE MXU push for every AC and BD block (head-block-diagonal LHS) ------------
    # LHS rows: [qw_h0 | qw_h1 | qr_h0 | qr_h1], each (BQ, HD) with the other head's
    # columns zeroed.  RHS rows: [k (BQ) ; rk (RLEN)].  Result (4*BQ, BQ+RLEN).
    lane_hd = jax.lax.broadcasted_iota(jnp.int32, (BQ, HD), 1)
    lhs_parts = []
    for qv in (qw, qr):
        for h in range(N_HEAD):
            lo, hi = h * D_HEAD, (h + 1) * D_HEAD
            lhs_parts.append(jnp.where((lane_hd >= lo) & (lane_hd < hi), qv, 0.0))
    lhs = jnp.concatenate(lhs_parts, axis=0)                    # (2*N_HEAD*BQ, HD)
    rhs = jnp.concatenate([k, rk], axis=0)                      # (BQ+RLEN, HD)
    sc = jax.lax.dot_general(lhs, rhs, (((1,), (1,)), ((), ())),
                             preferred_element_type=f32)        # (64, 24)
    ac = sc[0:N_HEAD * BQ, 0:BQ]                                # (32,16) rows: h-major, b-major q
    bd = sc[N_HEAD * BQ:2 * N_HEAD * BQ, BQ:BQ + RLEN]          # (32, 8)  same row order

    # ---- rel_shift (exact Transformer-XL semantics on the causal part) ----------------
    # shifted[row, col] = bd[row, (col % QLEN) + QLEN-1 - (row % QLEN)]  for j <= i,
    # 0 otherwise (those entries are killed by the additive mask anyway).
    lane = jax.lax.broadcasted_iota(jnp.int32, (N_HEAD * BQ, BQ), 1) & (QLEN - 1)
    sub  = jax.lax.broadcasted_iota(jnp.int32, (N_HEAD * BQ, BQ), 0) & (QLEN - 1)
    idx = lane + (QLEN - 1) - sub                               # in [0, 2*QLEN-2]
    bd_shift = jnp.where(idx == 0, bd[:, 0:1], 0.0)
    for d in range(1, QLEN):
        bd_shift = jnp.where(idx == d, bd[:, d:d + 1], bd_shift)

    # ---- scores (already scaled) + additive mask, ONE softmax over all blocks ---------
    score = ac + bd_shift + maskb_ref[...]                      # (32,16)
    m = jnp.max(score, axis=-1, keepdims=True)
    e = jnp.exp(score - m)                                      # masked cols -> exactly 0
    p = e * pl.reciprocal(jnp.sum(e, axis=-1, keepdims=True), approx=True)

    # ---- ONE P@V matmul; zero columns of p select the right batch's rows of v ---------
    pv = jnp.dot(p, v, preferred_element_type=f32)              # (32, HD)
    attn_vec = jnp.concatenate(
        [pv[h * BQ:(h + 1) * BQ, h * D_HEAD:(h + 1) * D_HEAD] for h in range(N_HEAD)],
        axis=1)                                                 # (BQ, HD) batch-major rows

    attn_out = jnp.dot(attn_vec, wo_ref[...], preferred_element_type=f32)  # (BQ, dm)

    # residual + post-LN (dec_attn, pre_lnorm=False)
    x2d = slab[0:BQ, :]
    y = _layer_norm(x2d + attn_out, ln1_g, ln1_b)

    # PositionwiseFF (post-lnorm), dropout = identity (eval)
    h1 = jnp.maximum(
        jnp.dot(y, w1_ref[...], preferred_element_type=f32) + ff_b1, 0.0)
    core = jnp.dot(h1, w2_ref[...], preferred_element_type=f32) + ff_b2
    out_ref[...] = _layer_norm(y + core, ln2_g, ln2_b)          # (BQ, dm) batch-major


# =============================================================================
# One-time parameter packing (hoisted out of the per-call path)
# =============================================================================
def pack_params(p):
    wq_t = p["qkv_w"][0:HD, :].T * SCALE        # fold the 1/sqrt(d_head) scale (exact)
    wk_t = p["qkv_w"][HD:2 * HD, :].T
    wv_t = p["qkv_w"][2 * HD:3 * HD, :].T
    wr_t = p["r_w"].T
    w_pack = jnp.concatenate([wq_t, wk_t, wv_t, wr_t], axis=1).astype(jnp.float32)

    pp = jnp.zeros((8, 128), jnp.float32)
    pp = pp.at[0, 0:32].set(p["ln1_g"].reshape(-1))
    pp = pp.at[0, 32:64].set(p["ln1_b"].reshape(-1))
    pp = pp.at[0, 64:96].set(p["ln2_g"].reshape(-1))
    pp = pp.at[0, 96:128].set(p["ln2_b"].reshape(-1))
    pp = pp.at[1, 0:64].set(p["ff_b1"].reshape(-1))
    pp = pp.at[1, 64:96].set(p["ff_b2"].reshape(-1))
    pp = pp.at[2, 0:HD].set((p["r_w_bias"] * SCALE).reshape(-1))
    pp = pp.at[2, HD:2 * HD].set((p["r_r_bias"] * SCALE).reshape(-1))

    return {
        "w_pack": w_pack,                               # (dm, 4*HD) = (32, 128)
        "wo_t": p["o_w"].T.astype(jnp.float32),         # (HD, dm)
        "w1_t": p["ff_w1"].T.astype(jnp.float32),       # (dm, d_inner)
        "w2_t": p["ff_w2"].T.astype(jnp.float32),       # (d_inner, dm)
        "pp": pp,                                       # (8, 128) small params
    }


# =============================================================================
# Wrapper (layout plumbing only; everything heavy happens inside the kernel)
# =============================================================================
def decoder_layer_forward(dec_inp, r, dec_attn_mask, pk):
    qlen, bsz, d_model = dec_inp.shape
    assert (qlen, bsz, d_model) == (QLEN, BSZ, D_MODEL), dec_inp.shape
    # TODO(synk): mems path (klen > qlen) and head_mask are not implemented.
    assert r.shape[0] == qlen and dec_attn_mask.shape == (qlen, qlen)

    # lane/sublane-dense 2-D inputs: [x batch-major ; r] as one slab
    x2d = dec_inp.transpose(1, 0, 2).reshape(bsz * qlen, d_model)
    r2d = r.reshape(qlen, d_model)
    slab = jnp.concatenate([x2d, r2d], axis=0)                       # (BQ+RLEN, dm)

    # additive mask bias in the kernel's packed score layout:
    # rows = [head0 (b-major queries) ; head1 (...)], cols = batch-major keys.
    causal = jnp.where(dec_attn_mask > 0.5, NEG_BIG, 0.0).astype(jnp.float32)
    same_batch = (jnp.arange(BQ)[:, None] // QLEN) == (jnp.arange(BQ)[None, :] // QLEN)
    bias16 = jnp.where(same_batch, jnp.tile(causal, (BSZ, BSZ)), NEG_BIG)
    mask_bias = jnp.concatenate([bias16] * N_HEAD, axis=0).astype(jnp.float32)  # (32,16)

    vmem = pltpu.MemorySpace.VMEM
    out2d = pl.pallas_call(
        decoder_layer_kernel,
        out_shape=jax.ShapeDtypeStruct((BQ, D_MODEL), jnp.float32),
        in_specs=[pl.BlockSpec(memory_space=vmem)] * 7,
        out_specs=pl.BlockSpec(memory_space=vmem),
    )(slab, mask_bias, pk["w_pack"], pk["wo_t"], pk["w1_t"], pk["w2_t"], pk["pp"])

    ff_output = out2d.reshape(bsz, qlen, d_model).transpose(1, 0, 2)  # (qlen,bsz,dm)
    return [ff_output]                                 # == [ff_output] + attn_outputs[1:]


# =============================================================================
# Pure-JAX reference (mirrors the PyTorch forward exactly, eval mode)
# =============================================================================
def reference_forward(dec_inp, r, mask, p):
    hp = jax.lax.Precision.HIGHEST
    qlen, bsz, dm = dec_inp.shape
    rlen = r.shape[0]
    w_heads = jnp.einsum("qbd,ed->qbe", dec_inp, p["qkv_w"], precision=hp)
    r_head_k = jnp.einsum("rd,ed->re", r.reshape(rlen, dm), p["r_w"],
                          precision=hp).reshape(rlen, N_HEAD, D_HEAD)
    wq, wk, wv = jnp.split(w_heads, 3, axis=-1)
    wq = wq.reshape(qlen, bsz, N_HEAD, D_HEAD)
    wk = wk.reshape(qlen, bsz, N_HEAD, D_HEAD)
    wv = wv.reshape(qlen, bsz, N_HEAD, D_HEAD)

    AC = jnp.einsum("ibnd,jbnd->ijbn", wq + p["r_w_bias"], wk, precision=hp)
    BD = jnp.einsum("ibnd,jnd->ijbn", wq + p["r_r_bias"], r_head_k, precision=hp)
    q_, k_ = BD.shape[0], BD.shape[1]
    zp = jnp.zeros((q_, 1, bsz, N_HEAD), BD.dtype)
    xp = jnp.concatenate([zp, BD], axis=1).reshape(k_ + 1, q_, bsz, N_HEAD)
    BD = xp[1:].reshape(q_, k_, bsz, N_HEAD)

    score = (AC + BD) * SCALE
    score = jnp.where(mask[:, :, None, None] > 0.5, NEG_BIG, score)
    prob = jax.nn.softmax(score, axis=1)
    attn_vec = jnp.einsum("ijbn,jbnd->ibnd", prob, wv,
                          precision=hp).reshape(qlen, bsz, HD)
    attn_out = jnp.einsum("ibh,dh->ibd", attn_vec, p["o_w"], precision=hp)

    def ln(x, g, b):
        mu = x.mean(-1, keepdims=True)
        var = ((x - mu) ** 2).mean(-1, keepdims=True)
        return (x - mu) / jnp.sqrt(var + LN_EPS) * g.reshape(-1) + b.reshape(-1)

    y = ln(dec_inp + attn_out, p["ln1_g"], p["ln1_b"])
    h = jax.nn.relu(jnp.einsum("ibd,fd->ibf", y, p["ff_w1"], precision=hp)
                    + p["ff_b1"].reshape(-1))
    core = jnp.einsum("ibf,df->ibd", h, p["ff_w2"], precision=hp) + p["ff_b2"].reshape(-1)
    return ln(y + core, p["ln2_g"], p["ln2_b"])


# =============================================================================
if __name__ == "__main__":
    key = jax.random.PRNGKey(0)
    ks = jax.random.split(key, 16)

    def init(k, shape, scale=0.05):
        return (scale * jax.random.normal(k, shape)).astype(jnp.float32)

    params = {
        "qkv_w": init(ks[0], (3 * HD, D_MODEL)),          # qkv_net.weight
        "r_w":   init(ks[1], (HD, D_MODEL)),              # r_net.weight
        "o_w":   init(ks[2], (D_MODEL, HD)),              # o_net.weight
        "r_w_bias": init(ks[3], (N_HEAD, D_HEAD)),
        "r_r_bias": init(ks[4], (N_HEAD, D_HEAD)),
        "ln1_g": (1.0 + init(ks[5], (1, D_MODEL))).astype(jnp.float32),
        "ln1_b": init(ks[6], (1, D_MODEL)),
        "ff_w1": init(ks[7], (D_INNER, D_MODEL)),
        "ff_b1": init(ks[8], (1, D_INNER)),
        "ff_w2": init(ks[9], (D_MODEL, D_INNER)),
        "ff_b2": init(ks[10], (1, D_MODEL)),
        "ln2_g": (1.0 + init(ks[11], (1, D_MODEL))).astype(jnp.float32),
        "ln2_b": init(ks[12], (1, D_MODEL)),
    }

    dec_inp = jax.random.normal(ks[13], (QLEN, BSZ, D_MODEL), jnp.float32)

    # sinusoidal relative position embedding r (rlen = klen = qlen, mems=None)
    pos_seq = jnp.arange(QLEN - 1, -1, -1, dtype=jnp.float32)
    inv_freq = 1.0 / (10000.0 ** (jnp.arange(0, D_MODEL, 2, dtype=jnp.float32) / D_MODEL))
    sinusoid = jnp.outer(pos_seq, inv_freq)
    r = jnp.concatenate([jnp.sin(sinusoid), jnp.cos(sinusoid)], axis=-1)[:, None, :]

    # causal mask: 1 above the diagonal (future positions are masked)
    dec_attn_mask = jnp.triu(jnp.ones((QLEN, QLEN), jnp.float32), k=1)

    packed = pack_params(params)                           # one-time setup cost
    fwd = jax.jit(decoder_layer_forward)
    outputs = fwd(dec_inp, r, dec_attn_mask, packed)
    ff_out = jax.block_until_ready(outputs[0])

    ref = reference_forward(dec_inp, r, dec_attn_mask, params)
    err = float(jnp.max(jnp.abs(ff_out - ref)))
    assert ff_out.shape == (QLEN, BSZ, D_MODEL), ff_out.shape
    # 5e-4 tolerance: approx softmax reciprocal + different matmul packing/accumulation
    # order (a real bug -- wrong shift / slice / mask -- shows up as O(0.1) error).
    assert err < 5e-4, f"kernel vs reference mismatch: {err}"
    print("KERNEL_OK")
</pallas_src>

<mosaic_0001>
module attributes {stable_mosaic.version = 11 : i64} {
  func.func @decoder_layer_kernel(%arg0: memref<24x32xf32, #tpu.memory_space<vmem>>, %arg1: memref<32x16xf32, #tpu.memory_space<vmem>>, %arg2: memref<32x128xf32, #tpu.memory_space<vmem>>, %arg3: memref<32x32xf32, #tpu.memory_space<vmem>>, %arg4: memref<32x64xf32, #tpu.memory_space<vmem>>, %arg5: memref<64x32xf32, #tpu.memory_space<vmem>>, %arg6: memref<8x128xf32, #tpu.memory_space<vmem>>, %arg7: memref<16x32xf32, #tpu.memory_space<vmem>>) attributes {dimension_semantics = [], scalar_prefetch = 0 : i64, scratch_operands = 0 : i64, tpu.core_type = #tpu.core_type<tc>} {
    %c0 = arith.constant 0 : index
    %c0_0 = arith.constant 0 : index
    %0 = vector.load %arg0[%c0, %c0_0] : memref<24x32xf32, #tpu.memory_space<vmem>>, vector<24x32xf32>
    %c0_1 = arith.constant 0 : index
    %c0_2 = arith.constant 0 : index
    %1 = vector.load %arg6[%c0_1, %c0_2] : memref<8x128xf32, #tpu.memory_space<vmem>>, vector<8x128xf32>
    %2 = vector.extract_strided_slice %1 {offsets = [0, 0], sizes = [1, 32], strides = [1, 1]} : vector<8x128xf32> to vector<1x32xf32>
    %3 = vector.extract_strided_slice %1 {offsets = [0, 32], sizes = [1, 32], strides = [1, 1]} : vector<8x128xf32> to vector<1x32xf32>
    %4 = vector.extract_strided_slice %1 {offsets = [0, 64], sizes = [1, 32], strides = [1, 1]} : vector<8x128xf32> to vector<1x32xf32>
    %5 = vector.extract_strided_slice %1 {offsets = [0, 96], sizes = [1, 32], strides = [1, 1]} : vector<8x128xf32> to vector<1x32xf32>
    %6 = vector.extract_strided_slice %1 {offsets = [1, 0], sizes = [1, 64], strides = [1, 1]} : vector<8x128xf32> to vector<1x64xf32>
    %7 = vector.extract_strided_slice %1 {offsets = [1, 64], sizes = [1, 32], strides = [1, 1]} : vector<8x128xf32> to vector<1x32xf32>
    %8 = vector.extract_strided_slice %1 {offsets = [2, 0], sizes = [1, 32], strides = [1, 1]} : vector<8x128xf32> to vector<1x32xf32>
    %9 = vector.extract_strided_slice %1 {offsets = [2, 32], sizes = [1, 32], strides = [1, 1]} : vector<8x128xf32> to vector<1x32xf32>
    %c0_3 = arith.constant 0 : index
    %c0_4 = arith.constant 0 : index
    %10 = vector.load %arg2[%c0_3, %c0_4] : memref<32x128xf32, #tpu.memory_space<vmem>>, vector<32x128xf32>
    %cst = arith.constant dense<0.000000e+00> : vector<24x128xf32>
    %11 = tpu.matmul %0, %10, %cst {dimension_numbers = #tpu.dot_dimension_numbers<[1], [0], [0], [1], [0, 0, 1, 1], [], []>} : vector<24x32xf32>, vector<32x128xf32>, vector<24x128xf32> -> vector<24x128xf32>
    %12 = vector.extract_strided_slice %11 {offsets = [0, 0], sizes = [16, 32], strides = [1, 1]} : vector<24x128xf32> to vector<16x32xf32>
    %13 = vector.extract_strided_slice %11 {offsets = [0, 32], sizes = [16, 32], strides = [1, 1]} : vector<24x128xf32> to vector<16x32xf32>
    %14 = vector.extract_strided_slice %11 {offsets = [0, 64], sizes = [16, 32], strides = [1, 1]} : vector<24x128xf32> to vector<16x32xf32>
    %15 = vector.extract_strided_slice %11 {offsets = [16, 96], sizes = [8, 32], strides = [1, 1]} : vector<24x128xf32> to vector<8x32xf32>
    %16 = vector.broadcast %8 : vector<1x32xf32> to vector<16x32xf32>
    %17 = arith.addf %12, %16 : vector<16x32xf32>
    %18 = vector.broadcast %9 : vector<1x32xf32> to vector<16x32xf32>
    %19 = arith.addf %12, %18 : vector<16x32xf32>
    %20 = tpu.iota {dimensions = array<i32: 1>} : vector<16x32xi32>
    %c0_i32 = arith.constant 0 : i32
    %21 = vector.broadcast %c0_i32 : i32 to vector<16x32xi32>
    %22 = arith.cmpi sge, %20, %21 : vector<16x32xi32>
    %c16_i32 = arith.constant 16 : i32
    %23 = vector.broadcast %c16_i32 : i32 to vector<16x32xi32>
    %24 = arith.cmpi slt, %20, %23 : vector<16x32xi32>
    %25 = arith.andi %22, %24 : vector<16x32xi1>
    %cst_5 = arith.constant 0.000000e+00 : f32
    %26 = vector.broadcast %cst_5 : f32 to vector<16x32xf32>
    %27 = arith.select %25, %17, %26 : vector<16x32xi1>, vector<16x32xf32>
    %c16_i32_6 = arith.constant 16 : i32
    %28 = vector.broadcast %c16_i32_6 : i32 to vector<16x32xi32>
    %29 = arith.cmpi sge, %20, %28 : vector<16x32xi32>
    %c32_i32 = arith.constant 32 : i32
    %30 = vector.broadcast %c32_i32 : i32 to vector<16x32xi32>
    %31 = arith.cmpi slt, %20, %30 : vector<16x32xi32>
    %32 = arith.andi %29, %31 : vector<16x32xi1>
    %cst_7 = arith.constant 0.000000e+00 : f32
    %33 = vector.broadcast %cst_7 : f32 to vector<16x32xf32>
    %34 = arith.select %32, %17, %33 : vector<16x32xi1>, vector<16x32xf32>
    %c0_i32_8 = arith.constant 0 : i32
    %35 = vector.broadcast %c0_i32_8 : i32 to vector<16x32xi32>
    %36 = arith.cmpi sge, %20, %35 : vector<16x32xi32>
    %c16_i32_9 = arith.constant 16 : i32
    %37 = vector.broadcast %c16_i32_9 : i32 to vector<16x32xi32>
    %38 = arith.cmpi slt, %20, %37 : vector<16x32xi32>
    %39 = arith.andi %36, %38 : vector<16x32xi1>
    %cst_10 = arith.constant 0.000000e+00 : f32
    %40 = vector.broadcast %cst_10 : f32 to vector<16x32xf32>
    %41 = arith.select %39, %19, %40 : vector<16x32xi1>, vector<16x32xf32>
    %c16_i32_11 = arith.constant 16 : i32
    %42 = vector.broadcast %c16_i32_11 : i32 to vector<16x32xi32>
    %43 = arith.cmpi sge, %20, %42 : vector<16x32xi32>
    %c32_i32_12 = arith.constant 32 : i32
    %44 = vector.broadcast %c32_i32_12 : i32 to vector<16x32xi32>
    %45 = arith.cmpi slt, %20, %44 : vector<16x32xi32>
    %46 = arith.andi %43, %45 : vector<16x32xi1>
    %cst_13 = arith.constant 0.000000e+00 : f32
    %47 = vector.broadcast %cst_13 : f32 to vector<16x32xf32>
    %48 = arith.select %46, %19, %47 : vector<16x32xi1>, vector<16x32xf32>
    %49 = tpu.concatenate %27, %34, %41, %48 in 0 : vector<16x32xf32>, vector<16x32xf32>, vector<16x32xf32>, vector<16x32xf32> -> vector<64x32xf32>
    %50 = tpu.concatenate %13, %15 in 0 : vector<16x32xf32>, vector<8x32xf32> -> vector<24x32xf32>
    %cst_14 = arith.constant dense<0.000000e+00> : vector<64x24xf32>
    %51 = tpu.matmul %49, %50, %cst_14 {dimension_numbers = #tpu.dot_dimension_numbers<[1], [1], [0], [0], [0, 0, 1, 0], [], []>} : vector<64x32xf32>, vector<24x32xf32>, vector<64x24xf32> -> vector<64x24xf32>
    %52 = vector.extract_strided_slice %51 {offsets = [0, 0], sizes = [32, 16], strides = [1, 1]} : vector<64x24xf32> to vector<32x16xf32>
    %53 = vector.extract_strided_slice %51 {offsets = [32, 16], sizes = [32, 8], strides = [1, 1]} : vector<64x24xf32> to vector<32x8xf32>
    %54 = tpu.iota {dimensions = array<i32: 1>} : vector<32x16xi32>
    %c7_i32 = arith.constant 7 : i32
    %55 = vector.broadcast %c7_i32 : i32 to vector<32x16xi32>
    %56 = arith.andi %54, %55 : vector<32x16xi32>
    %57 = tpu.iota {dimensions = array<i32: 0>} : vector<32x16xi32>
    %c7_i32_15 = arith.constant 7 : i32
    %58 = vector.broadcast %c7_i32_15 : i32 to vector<32x16xi32>
    %59 = arith.andi %57, %58 : vector<32x16xi32>
    %c7_i32_16 = arith.constant 7 : i32
    %60 = vector.broadcast %c7_i32_16 : i32 to vector<32x16xi32>
    %61 = arith.addi %56, %60 : vector<32x16xi32>
    %62 = arith.subi %61, %59 : vector<32x16xi32>
    %c0_i32_17 = arith.constant 0 : i32
    %63 = vector.broadcast %c0_i32_17 : i32 to vector<32x16xi32>
    %64 = arith.cmpi eq, %62, %63 : vector<32x16xi32>
    %65 = vector.extract_strided_slice %53 {offsets = [0, 0], sizes = [32, 1], strides = [1, 1]} : vector<32x8xf32> to vector<32x1xf32>
    %cst_18 = arith.constant 0.000000e+00 : f32
    %66 = vector.shape_cast %65 : vector<32x1xf32> to vector<32x1xf32>
    %67 = vector.broadcast %66 : vector<32x1xf32> to vector<32x16xf32>
    %68 = vector.broadcast %cst_18 : f32 to vector<32x16xf32>
    %69 = arith.select %64, %67, %68 : vector<32x16xi1>, vector<32x16xf32>
    %c1_i32 = arith.constant 1 : i32
    %70 = vector.broadcast %c1_i32 : i32 to vector<32x16xi32>
    %71 = arith.cmpi eq, %62, %70 : vector<32x16xi32>
    %72 = vector.extract_strided_slice %53 {offsets = [0, 1], sizes = [32, 1], strides = [1, 1]} : vector<32x8xf32> to vector<32x1xf32>
    %73 = vector.shape_cast %72 : vector<32x1xf32> to vector<32x1xf32>
    %74 = vector.broadcast %73 : vector<32x1xf32> to vector<32x16xf32>
    %75 = arith.select %71, %74, %69 : vector<32x16xi1>, vector<32x16xf32>
    %c2_i32 = arith.constant 2 : i32
    %76 = vector.broadcast %c2_i32 : i32 to vector<32x16xi32>
    %77 = arith.cmpi eq, %62, %76 : vector<32x16xi32>
    %78 = vector.extract_strided_slice %53 {offsets = [0, 2], sizes = [32, 1], strides = [1, 1]} : vector<32x8xf32> to vector<32x1xf32>
    %79 = vector.shape_cast %78 : vector<32x1xf32> to vector<32x1xf32>
    %80 = vector.broadcast %79 : vector<32x1xf32> to vector<32x16xf32>
    %81 = arith.select %77, %80, %75 : vector<32x16xi1>, vector<32x16xf32>
    %c3_i32 = arith.constant 3 : i32
    %82 = vector.broadcast %c3_i32 : i32 to vector<32x16xi32>
    %83 = arith.cmpi eq, %62, %82 : vector<32x16xi32>
    %84 = vector.extract_strided_slice %53 {offsets = [0, 3], sizes = [32, 1], strides = [1, 1]} : vector<32x8xf32> to vector<32x1xf32>
    %85 = vector.shape_cast %84 : vector<32x1xf32> to vector<32x1xf32>
    %86 = vector.broadcast %85 : vector<32x1xf32> to vector<32x16xf32>
    %87 = arith.select %83, %86, %81 : vector<32x16xi1>, vector<32x16xf32>
    %c4_i32 = arith.constant 4 : i32
    %88 = vector.broadcast %c4_i32 : i32 to vector<32x16xi32>
    %89 = arith.cmpi eq, %62, %88 : vector<32x16xi32>
    %90 = vector.extract_strided_slice %53 {offsets = [0, 4], sizes = [32, 1], strides = [1, 1]} : vector<32x8xf32> to vector<32x1xf32>
    %91 = vector.shape_cast %90 : vector<32x1xf32> to vector<32x1xf32>
    %92 = vector.broadcast %91 : vector<32x1xf32> to vector<32x16xf32>
    %93 = arith.select %89, %92, %87 : vector<32x16xi1>, vector<32x16xf32>
    %c5_i32 = arith.constant 5 : i32
    %94 = vector.broadcast %c5_i32 : i32 to vector<32x16xi32>
    %95 = arith.cmpi eq, %62, %94 : vector<32x16xi32>
    %96 = vector.extract_strided_slice %53 {offsets = [0, 5], sizes = [32, 1], strides = [1, 1]} : vector<32x8xf32> to vector<32x1xf32>
    %97 = vector.shape_cast %96 : vector<32x1xf32> to vector<32x1xf32>
    %98 = vector.broadcast %97 : vector<32x1xf32> to vector<32x16xf32>
    %99 = arith.select %95, %98, %93 : vector<32x16xi1>, vector<32x16xf32>
    %c6_i32 = arith.constant 6 : i32
    %100 = vector.broadcast %c6_i32 : i32 to vector<32x16xi32>
    %101 = arith.cmpi eq, %62, %100 : vector<32x16xi32>
    %102 = vector.extract_strided_slice %53 {offsets = [0, 6], sizes = [32, 1], strides = [1, 1]} : vector<32x8xf32> to vector<32x1xf32>
    %103 = vector.shape_cast %102 : vector<32x1xf32> to vector<32x1xf32>
    %104 = vector.broadcast %103 : vector<32x1xf32> to vector<32x16xf32>
    %105 = arith.select %101, %104, %99 : vector<32x16xi1>, vector<32x16xf32>
    %c7_i32_19 = arith.constant 7 : i32
    %106 = vector.broadcast %c7_i32_19 : i32 to vector<32x16xi32>
    %107 = arith.cmpi eq, %62, %106 : vector<32x16xi32>
    %108 = vector.extract_strided_slice %53 {offsets = [0, 7], sizes = [32, 1], strides = [1, 1]} : vector<32x8xf32> to vector<32x1xf32>
    %109 = vector.shape_cast %108 : vector<32x1xf32> to vector<32x1xf32>
    %110 = vector.broadcast %109 : vector<32x1xf32> to vector<32x16xf32>
    %111 = arith.select %107, %110, %105 : vector<32x16xi1>, vector<32x16xf32>
    %112 = arith.addf %52, %111 : vector<32x16xf32>
    %c0_20 = arith.constant 0 : index
    %c0_21 = arith.constant 0 : index
    %113 = vector.load %arg1[%c0_20, %c0_21] : memref<32x16xf32, #tpu.memory_space<vmem>>, vector<32x16xf32>
    %114 = arith.addf %112, %113 : vector<32x16xf32>
    %cst_22 = arith.constant dense<0xFF800000> : vector<32xf32>
    %115 = vector.multi_reduction <maximumf>, %114, %cst_22 [1] : vector<32x16xf32> to vector<32xf32>
    %116 = vector.shape_cast %115 : vector<32xf32> to vector<32x1xf32>
    %117 = vector.broadcast %116 : vector<32x1xf32> to vector<32x16xf32>
    %118 = arith.subf %114, %117 : vector<32x16xf32>
    %119 = math.exp %118 : vector<32x16xf32>
    %cst_23 = arith.constant dense<0.000000e+00> : vector<32xf32>
    %120 = vector.multi_reduction <add>, %119, %cst_23 [1] : vector<32x16xf32> to vector<32xf32>
    %121 = vector.shape_cast %120 : vector<32xf32> to vector<32x1xf32>
    %122 = tpu.reciprocal %121 {approx = true} : vector<32x1xf32> -> vector<32x1xf32>
    %123 = vector.broadcast %122 : vector<32x1xf32> to vector<32x16xf32>
    %124 = arith.mulf %119, %123 : vector<32x16xf32>
    %cst_24 = arith.constant dense<0.000000e+00> : vector<32x32xf32>
    %125 = tpu.matmul %124, %14, %cst_24 {dimension_numbers = #tpu.dot_dimension_numbers<[1], [0], [0], [1], [0, 0, 1, 1], [], []>} : vector<32x16xf32>, vector<16x32xf32>, vector<32x32xf32> -> vector<32x32xf32>
    %126 = vector.extract_strided_slice %125 {offsets = [0, 0], sizes = [16, 16], strides = [1, 1]} : vector<32x32xf32> to vector<16x16xf32>
    %127 = vector.extract_strided_slice %125 {offsets = [16, 16], sizes = [16, 16], strides = [1, 1]} : vector<32x32xf32> to vector<16x16xf32>
    %128 = tpu.concatenate %126, %127 in 1 : vector<16x16xf32>, vector<16x16xf32> -> vector<16x32xf32>
    %c0_25 = arith.constant 0 : index
    %c0_26 = arith.constant 0 : index
    %129 = vector.load %arg3[%c0_25, %c0_26] : memref<32x32xf32, #tpu.memory_space<vmem>>, vector<32x32xf32>
    %cst_27 = arith.constant dense<0.000000e+00> : vector<16x32xf32>
    %130 = tpu.matmul %128, %129, %cst_27 {dimension_numbers = #tpu.dot_dimension_numbers<[1], [0], [0], [1], [0, 0, 1, 1], [], []>} : vector<16x32xf32>, vector<32x32xf32>, vector<16x32xf32> -> vector<16x32xf32>
    %131 = vector.extract_strided_slice %0 {offsets = [0, 0], sizes = [16, 32], strides = [1, 1]} : vector<24x32xf32> to vector<16x32xf32>
    %132 = arith.addf %131, %130 : vector<16x32xf32>
    %cst_28 = arith.constant dense<0.000000e+00> : vector<16xf32>
    %133 = vector.multi_reduction <add>, %132, %cst_28 [1] : vector<16x32xf32> to vector<16xf32>
    %134 = vector.shape_cast %133 : vector<16xf32> to vector<16x1xf32>
    %cst_29 = arith.constant 3.200000e+01 : f32
    %135 = vector.broadcast %cst_29 : f32 to vector<16x1xf32>
    %136 = arith.divf %134, %135 : vector<16x1xf32>
    %137 = vector.broadcast %136 : vector<16x1xf32> to vector<16x32xf32>
    %138 = arith.subf %132, %137 : vector<16x32xf32>
    %139 = arith.mulf %138, %138 : vector<16x32xf32>
    %cst_30 = arith.constant dense<0.000000e+00> : vector<16xf32>
    %140 = vector.multi_reduction <add>, %139, %cst_30 [1] : vector<16x32xf32> to vector<16xf32>
    %141 = vector.shape_cast %140 : vector<16xf32> to vector<16x1xf32>
    %cst_31 = arith.constant 3.200000e+01 : f32
    %142 = vector.broadcast %cst_31 : f32 to vector<16x1xf32>
    %143 = arith.divf %141, %142 : vector<16x1xf32>
    %144 = vector.broadcast %136 : vector<16x1xf32> to vector<16x32xf32>
    %145 = arith.subf %132, %144 : vector<16x32xf32>
    %cst_32 = arith.constant 9.99999974E-6 : f32
    %146 = vector.broadcast %cst_32 : f32 to vector<16x1xf32>
    %147 = arith.addf %143, %146 : vector<16x1xf32>
    %148 = math.rsqrt %147 : vector<16x1xf32>
    %149 = vector.broadcast %148 : vector<16x1xf32> to vector<16x32xf32>
    %150 = arith.mulf %145, %149 : vector<16x32xf32>
    %151 = vector.broadcast %2 : vector<1x32xf32> to vector<16x32xf32>
    %152 = arith.mulf %150, %151 : vector<16x32xf32>
    %153 = vector.broadcast %3 : vector<1x32xf32> to vector<16x32xf32>
    %154 = arith.addf %152, %153 : vector<16x32xf32>
    %c0_33 = arith.constant 0 : index
    %c0_34 = arith.constant 0 : index
    %155 = vector.load %arg4[%c0_33, %c0_34] : memref<32x64xf32, #tpu.memory_space<vmem>>, vector<32x64xf32>
    %cst_35 = arith.constant dense<0.000000e+00> : vector<16x64xf32>
    %156 = tpu.matmul %154, %155, %cst_35 {dimension_numbers = #tpu.dot_dimension_numbers<[1], [0], [0], [1], [0, 0, 1, 1], [], []>} : vector<16x32xf32>, vector<32x64xf32>, vector<16x64xf32> -> vector<16x64xf32>
    %157 = vector.broadcast %6 : vector<1x64xf32> to vector<16x64xf32>
    %158 = arith.addf %156, %157 : vector<16x64xf32>
    %cst_36 = arith.constant 0.000000e+00 : f32
    %159 = vector.broadcast %cst_36 : f32 to vector<16x64xf32>
    %160 = arith.maximumf %158, %159 : vector<16x64xf32>
    %c0_37 = arith.constant 0 : index
    %c0_38 = arith.constant 0 : index
    %161 = vector.load %arg5[%c0_37, %c0_38] : memref<64x32xf32, #tpu.memory_space<vmem>>, vector<64x32xf32>
    %cst_39 = arith.constant dense<0.000000e+00> : vector<16x32xf32>
    %162 = tpu.matmul %160, %161, %cst_39 {dimension_numbers = #tpu.dot_dimension_numbers<[1], [0], [0], [1], [0, 0, 1, 1], [], []>} : vector<16x64xf32>, vector<64x32xf32>, vector<16x32xf32> -> vector<16x32xf32>
    %163 = vector.broadcast %7 : vector<1x32xf32> to vector<16x32xf32>
    %164 = arith.addf %162, %163 : vector<16x32xf32>
    %165 = arith.addf %154, %164 : vector<16x32xf32>
    %cst_40 = arith.constant dense<0.000000e+00> : vector<16xf32>
    %166 = vector.multi_reduction <add>, %165, %cst_40 [1] : vector<16x32xf32> to vector<16xf32>
    %167 = vector.shape_cast %166 : vector<16xf32> to vector<16x1xf32>
    %cst_41 = arith.constant 3.200000e+01 : f32
    %168 = vector.broadcast %cst_41 : f32 to vector<16x1xf32>
    %169 = arith.divf %167, %168 : vector<16x1xf32>
    %170 = vector.broadcast %169 : vector<16x1xf32> to vector<16x32xf32>
    %171 = arith.subf %165, %170 : vector<16x32xf32>
    %172 = arith.mulf %171, %171 : vector<16x32xf32>
    %cst_42 = arith.constant dense<0.000000e+00> : vector<16xf32>
    %173 = vector.multi_reduction <add>, %172, %cst_42 [1] : vector<16x32xf32> to vector<16xf32>
    %174 = vector.shape_cast %173 : vector<16xf32> to vector<16x1xf32>
    %cst_43 = arith.constant 3.200000e+01 : f32
    %175 = vector.broadcast %cst_43 : f32 to vector<16x1xf32>
    %176 = arith.divf %174, %175 : vector<16x1xf32>
    %177 = vector.broadcast %169 : vector<16x1xf32> to vector<16x32xf32>
    %178 = arith.subf %165, %177 : vector<16x32xf32>
    %cst_44 = arith.constant 9.99999974E-6 : f32
    %179 = vector.broadcast %cst_44 : f32 to vector<16x1xf32>
    %180 = arith.addf %176, %179 : vector<16x1xf32>
    %181 = math.rsqrt %180 : vector<16x1xf32>
    %182 = vector.broadcast %181 : vector<16x1xf32> to vector<16x32xf32>
    %183 = arith.mulf %178, %182 : vector<16x32xf32>
    %184 = vector.broadcast %4 : vector<1x32xf32> to vector<16x32xf32>
    %185 = arith.mulf %183, %184 : vector<16x32xf32>
    %186 = vector.broadcast %5 : vector<1x32xf32> to vector<16x32xf32>
    %187 = arith.addf %185, %186 : vector<16x32xf32>
    %c0_45 = arith.constant 0 : index
    %c0_46 = arith.constant 0 : index
    %188 = vector.load %arg7[%c0_45, %c0_46] : memref<16x32xf32, #tpu.memory_space<vmem>>, vector<16x32xf32>
    tpu.vector_store %arg7[%c0_45, %c0_46], %187 {strides = array<i32>} : memref<16x32xf32, #tpu.memory_space<vmem>>, vector<16x32xf32>,
    return
  }
}

</mosaic_0001>

<bundles_post_ra>
// kernel: tile.8
= control target key start
LH: loop header
LB: loop body
LE: loop exit
PB: predicated region body
PF: predicated region fallthrough
CT: control target
= control target key end

     0   :  { %s154_s0 = inlined_call_operand.vmem [shape: f32[8,8], index: 0, kind: input, shape index: {}]   ;;  %s155_s1 = inlined_call_operand.vmem [shape: f32[2,8,2,8], index: 1, kind: output, shape index: {}]  }
   0x1   :  { %v4_v0 = vld [vmem:[%s154_s0] ss:$0 sm:$0xff]  ;;  %v51_v1 = vld [vmem:[%s154_s0 + $0x1] ss:$0 sm:$0xff]  ;;  %v54_v2 = vld [vmem:[%s154_s0 + $0x2] ss:$0 sm:$0xff] }
   0x2   :  { %5 = vst [vmem:[%s155_s1] sm:$0x3] %v4_v0  ;;  %50 = vst [vmem:[%s155_s1 + $0x10] sm:$0x3] %v4_v0  ;;  %v57_v3 = vld [vmem:[%s154_s0 + $0x3] ss:$0 sm:$0xff] }
   0x3   :  { %52 = vst [vmem:[%s155_s1 + $0x2] sm:$0x3] %v51_v1  ;;  %53 = vst [vmem:[%s155_s1 + $0x12] sm:$0x3] %v51_v1  ;;  %v60_v4 = vld [vmem:[%s154_s0 + $0x4] ss:$0 sm:$0xff] }
   0x4   :  { %55 = vst [vmem:[%s155_s1 + $0x4] sm:$0x3] %v54_v2  ;;  %56 = vst [vmem:[%s155_s1 + $0x14] sm:$0x3] %v54_v2  ;;  %v63_v5 = vld [vmem:[%s154_s0 + $0x5] ss:$0 sm:$0xff] }
   0x5   :  { %58 = vst [vmem:[%s155_s1 + $0x6] sm:$0x3] %v57_v3  ;;  %59 = vst [vmem:[%s155_s1 + $0x16] sm:$0x3] %v57_v3  ;;  %v66_v6 = vld [vmem:[%s154_s0 + $0x6] ss:$0 sm:$0xff] }
   0x6   :  { %61 = vst [vmem:[%s155_s1 + $0x8] sm:$0x3] %v60_v4  ;;  %62 = vst [vmem:[%s155_s1 + $0x18] sm:$0x3] %v60_v4  ;;  %v69_v7 = vld [vmem:[%s154_s0 + $0x7] ss:$0 sm:$0xff] }
   0x7   :  { %64 = vst [vmem:[%s155_s1 + $0xa] sm:$0x3] %v63_v5  ;;  %65 = vst [vmem:[%s155_s1 + $0x1a] sm:$0x3] %v63_v5 }
   0x8   :  { %67 = vst [vmem:[%s155_s1 + $0xc] sm:$0x3] %v66_v6  ;;  %68 = vst [vmem:[%s155_s1 + $0x1c] sm:$0x3] %v66_v6 }
   0x9   :  { %70 = vst [vmem:[%s155_s1 + $0xe] sm:$0x3] %v69_v7  ;;  %71 = vst [vmem:[%s155_s1 + $0x1e] sm:$0x3] %v69_v7 }

// kernel: tile.9
= control target key start
LH: loop header
LB: loop body
LE: loop exit
PB: predicated region body
PF: predicated region fallthrough
CT: control target
= control target key end

     0   :  { %vm82_vm0 = vcmask 1047556   ;;  %vm84_vm1 = vcmask 64512   ;;  %vm103_vm2 = vcmask 130112   ;;  %s225_s0 = inlined_call_operand.vmem [shape: f32[2,8,2,8], index: 0, kind: input, shape index: {}]   ;;  %s226_s1 = inlined_call_operand.vmem [shape: f32[16,16], index: 1, kind: output, shape index: {}]  }
   0x1   :  { %v138_v0 = vld [vmem:[%s225_s0 + $0xe] sm:$0x3]  ;;  %v139_v1 = vld [vmem:[%s225_s0 + $0xc] sm:$0x3]  ;;  %v140_v2 = vld [vmem:[%s225_s0 + $0xa] sm:$0x3] }
   0x2   :  { %48 = vst [vmem:[#allocation0 + $0x38] sm:$0x3] %v138_v0  ;;  %53 = vst [vmem:[#allocation0 + $0x30] sm:$0x3] %v139_v1  ;;  %v141_v3 = vld [vmem:[%s225_s0 + $0x8] sm:$0x3] }
   0x3   :  { %58 = vst [vmem:[#allocation0 + $0x28] sm:$0x3] %v140_v2  ;;  %v142_v4 = vld [vmem:[%s225_s0 + $0x6] sm:$0x3]  ;;  %v143_v5 = vld [vmem:[%s225_s0 + $0x4] sm:$0x3] }
   0x4   :  { %63 = vst [vmem:[#allocation0 + $0x20] sm:$0x3] %v141_v3  ;;  %68 = vst [vmem:[#allocation0 + $0x18] sm:$0x3] %v142_v4  ;;  %v144_v6 = vld [vmem:[%s225_s0 + $0x2] sm:$0x3] }
   0x5   :  { %73 = vst [vmem:[#allocation0 + $0x10] sm:$0x3] %v143_v5  ;;  %v78_v7 = vld [vmem:[%s225_s0] sm:$0x3]  ;;  %77 = vst [vmem:[#allocation0 + $0x8] sm:$0x3] %v144_v6 }
   0x6   :  { %79 = vst [vmem:[#allocation0] sm:$0x3] %v78_v7  ;;  %v130_v8 = vld [vmem:[%s225_s0 + $0x1e] sm:$0x3]  ;;  %v131_v9 = vld [vmem:[%s225_s0 + $0x1c] sm:$0x3] }
   0x7   :  { %v132_v10 = vld [vmem:[%s225_s0 + $0x1a] sm:$0x3]  ;;  %8 = vst [vmem:[#allocation0 + $0x78] sm:$0x3] %v130_v8  ;;  %13 = vst [vmem:[#allocation0 + $0x70] sm:$0x3] %v131_v9 }
   0x8   :  { %18 = vst [vmem:[#allocation0 + $0x68] sm:$0x3] %v132_v10  ;;  %v133_v11 = vld [vmem:[%s225_s0 + $0x18] sm:$0x3]  ;;  %v134_v12 = vld [vmem:[%s225_s0 + $0x16] sm:$0x3] }
   0x9   :  { %v135_v13 = vld [vmem:[%s225_s0 + $0x14] sm:$0x3]  ;;  %23 = vst [vmem:[#allocation0 + $0x60] sm:$0x3] %v133_v11  ;;  %28 = vst [vmem:[#allocation0 + $0x58] sm:$0x3] %v134_v12 }
   0xa   :  { %33 = vst [vmem:[#allocation0 + $0x50] sm:$0x3] %v135_v13  ;;  %v136_v14 = vld [vmem:[%s225_s0 + $0x12] sm:$0x3]  ;;  %v137_v15 = vld [vmem:[%s225_s0 + $0x10] sm:$0x3] }
   0xb   :  { %38 = vst [vmem:[#allocation0 + $0x48] sm:$0x3] %v136_v14  ;;  %43 = vst [vmem:[#allocation0 + $0x40] sm:$0x3] %v137_v15  ;;  %s148_s0 = smov 8  }
   0xc   :  { %v98_v16 = vld [vmem:[#allocation0 + $0x1] ss:$8 sm:$0xf0]   ;;  %v81_v17 = vld [vmem:[#allocation0] ss:$8 sm:$0xf0]  }
   0xd   :  { %v96_v18 = vld [vmem:[#allocation0 + $0x1] ss:$8 sm:$0xf]   ;;  %v80_v19 = vld [vmem:[#allocation0] ss:$8 sm:$0xf]  }
   0xe   :  { %v100_v20 = vsel %vm82_vm0, %v98_v16, %v96_v18  ;;  %v83_v21 = vsel %vm82_vm0, %v81_v17, %v80_v19 }
   0xf   :  { %101 = vrot.lane.b32.xlu0 %v100_v20, %s148_s0  ;;  %85 = vst.msk [vmem:[%s226_s1] sm:$0xff] %vm84_vm1, %v83_v21  }
  0x10   :  { %v108_v22 = vld [vmem:[#allocation0 + $0x41] ss:$8 sm:$0xf0]   ;;  %v89_v23 = vld [vmem:[#allocation0 + $0x40] ss:$8 sm:$0xf0]  }
  0x12   :  { %v106_v24 = vld [vmem:[#allocation0 + $0x41] ss:$8 sm:$0xf]   ;;  %v87_v25 = vld [vmem:[#allocation0 + $0x40] ss:$8 sm:$0xf]  }
  0x13   :  { %v110_v26 = vsel %vm82_vm0, %v108_v22, %v106_v24  ;;  %v91_v27 = vsel %vm82_vm0, %v89_v23, %v87_v25 }
  0x14   :  { %145 = vst.msk [vmem:[%s226_s1 + $0x8] sm:$0xff] %vm84_vm1, %v91_v27   ;;  %111 = vrot.lane.b32.xlu0 %v110_v26, %s148_s0 }
  0x81   :  { %v102_v28 = vpop.permute.xlu0 %101  }
  0x82   :  { %104 = vst.msk [vmem:[%s226_s1] sm:$0xff] %vm103_vm2, %v102_v28  }
  0x86   :  { %v112_v29 = vpop.permute.xlu0 %111  }
  0x87   :  { %146 = vst.msk [vmem:[%s226_s1 + $0x8] sm:$0xff] %vm103_vm2, %v112_v29  }

// kernel: decoder_layer_forward.1
= control target key start
LH: loop header
LB: loop body
LE: loop exit
PB: predicated region body
PF: predicated region fallthrough
CT: control target
= control target key end

     0   :  { %v1310_v0 = vmov 0.0|0.0   ;;  %vm1311_vm0 = vmmov 0   ;;  %v1312_v4 = vmov 0.0   ;;  %vm34_vm1 = vcmask 261120   ;;  %s1601_s2 = inlined_call_operand.vmem [shape: f32[32,128], index: 2, kind: input, shape index: {}]   ;;  %s1602_s0 = inlined_call_operand.vmem [shape: f32[24,32], index: 0, kind: input, shape index: {}]   ;;  %s1603_s6 = inlined_call_operand.vmem [shape: f32[8,128], index: 6, kind: input, shape index: {}]   ;;  %s1604_s1 = inlined_call_operand.vmem [shape: f32[32,16], index: 1, kind: input, shape index: {}]   ;;  %s1605_s3 = inlined_call_operand.vmem [shape: f32[32,32], index: 3, kind: input, shape index: {}]   ;;  %s1606_s4 = inlined_call_operand.vmem [shape: f32[32,64], index: 4, kind: input, shape index: {}]   ;;  %s1607_s5 = inlined_call_operand.vmem [shape: f32[64,32], index: 5, kind: input, shape index: {}]   ;;  %s1608_s7 = inlined_call_operand.vmem [shape: f32[16,32], index: 7, kind: output, shape index: {}]  }
   0x1   :  { %1182 = vmatprep.subr.bf16.mxu1 %v1310_v0  ;;  %v30_v1 = vld [vmem:[%s1601_s2] sm:$0xff]  ;;  %v31_v2 = vld [vmem:[%s1601_s2 + $0x8] sm:$0xff]  ;;  %v32_v3 = vld [vmem:[%s1601_s2 + $0x10] sm:$0xff]  ;;  %1104 = vmatprep.mubr.msk.f32.mxu1 %vm1311_vm0, %v1312_v4  ;;  %v124_v11 = vlaneseq  ;;  %v1315_v44 = vmov 17   ;;  %v1316_v45 = vmov 16   ;;  %v1317_v53 = vmov 20  }
   0x2   :  { %v1183_v5 = vpack.c.bf16 %v31_v2, %v30_v1  ;;  %v33_v6 = vld [vmem:[%s1601_s2 + $0x18] sm:$0xff]  ;;  %v1380_v8 = vld [vmem:[%s1602_s0] sm:$0xff]  ;;  %v1388_v9 = vld [vmem:[%s1602_s0 + $0x8] sm:$0xff]  ;;  %1250 = vset.pattern.permute.xlu0 %v1315_v44  ;;  %1249 = vset.pattern.permute.xlu1 %v1316_v45  ;;  %v1318_v54 = vmov 18   ;;  %v1319_v56 = vmov 22   ;;  %v1320_v57 = vmov 19  }
   0x3   :  { %v1186_v7 = vpack.c.bf16 %v33_v6, %v32_v3  ;;  %v28_v10 = vld [vmem:[%s1602_s0 + $0x10] sm:$0xff]  ;;  %v1397_v12 = vshrl.u32 %v124_v11, 7  ;;  %v1400_v14 = vand.u32 127, %v124_v11  ;;  %v1405_v15 = vld [vmem:[%s1603_s6] sm:$0xff]  ;;  %s1313_s0 = smov 64   ;;  %s1314_s6 = smov 96   ;;  %vm1189_vm6 = vmpackc.low %vm34_vm1, %vm34_vm1 }
   0x4   :  { %1184 = vmatpush3.bf16.msra.mxu1 %v1183_v5  ;;  %v1321_v58 = vmov 21   ;;  %v1322_v59 = vmov 23   ;;  %vm521_vm15 = vcmask 130048  }
   0x5   :  { %1185 = vmatprep.subr.bf16.mxu1 %v1310_v0  ;;  %v126_v13 = vsub.s32 2, %v1397_v12  ;;  %vm143_vm2 = vcmp.ge.s32.totalorder %v1400_v14, 16  ;;  %vm144_vm3 = vcmp.lt.s32.totalorder %v1400_v14, 32  ;;  %vm139_vm4 = vcmp.lt.s32.totalorder %v1400_v14, 16 }
   0x6   :  { %vm1411_vm5 = vmand %vm143_vm2, %vm144_vm3  ;;  %v298_v60 = vand.u32 7, %v1400_v14  ;;  %v301_v61 = vadd.s32 8, %v1397_v12 }
   0x7   :  { %v127_v16 = vrot.slane %v1405_v15, %v126_v13 }
   0x8   :  { %1187 = vmatpush3.bf16.msra.mxu1 %v1186_v7  ;;  %v305_v62 = vand.u32 7, %v301_v61  ;;  %v1468_v63 = vadd.s32 7, %v298_v60 }
   0xa   :  { %v310_v2 = vsub.s32 %v1468_v63, %v305_v62 }
   0xb   :  { %1105 = vmatmul.mubr.msk.f32.vlgmr.msra.gmra.mrb[0].mxu1 %vm34_vm1, %v1380_v8 }
   0xc   :  { %1107 = vmatprep.mubr.msk.f32.mxu1 %vm1311_vm0, %v1312_v4  ;;  %vm314_vm7 = vcmp.eq.s32.totalorder %v310_v2, 0  ;;  %vm342_vm8 = vcmp.eq.s32.totalorder %v310_v2, 1  ;;  %vm366_vm9 = vcmp.eq.s32.totalorder %v310_v2, 2  ;;  %vm390_vm10 = vcmp.eq.s32.totalorder %v310_v2, 3 }
   0xd   :  { %vm414_vm11 = vcmp.eq.s32.totalorder %v310_v2, 4  ;;  %vm438_vm12 = vcmp.eq.s32.totalorder %v310_v2, 5  ;;  %vm462_vm13 = vcmp.eq.s32.totalorder %v310_v2, 6  ;;  %vm486_vm14 = vcmp.eq.s32.totalorder %v310_v2, 7 }
   0xf   :  { %1108 = vmatmul.mubr.msk.f32.gmra.mrb[2].mxu1 %vm34_vm1, %v1388_v9 }
  0x10   :  { %1110 = vmatprep.mubr.msk.f32.mxu1 %vm1311_vm0, %v1312_v4 }
  0x13   :  { %1111 = vmatmul.mubr.msk.f32.gmra.mrb[4].mxu1 %vm34_vm1, %v28_v10 }
  0xde   :  { %v110_v17 = vpop.f32.mrb[0].mxu1 }
  0xdf   :  { %v1106_v19 = vpop.f32.mrb[1].mxu1  ;;  %v128_v20 = vadd.f32 %v127_v16, %v110_v17 }
  0xe0   :  { %v304_v19 = vand.u32 7, %v1397_v12 }
  0xe1   :  { %v141_v21 = vsel %vm139_vm4, %v128_v20, 0.0  ;;  %v146_v22 = vsel %vm1411_vm5, %v128_v20, 0.0 }
  0xe2   :  { %v115_v23 = vpop.f32.mrb[2].mxu1  ;;  %1119 = vmatprep.mubr.msk.f32.mxu1 %vm34_vm1, %v141_v21 }
  0xe3   :  { %v129_v24 = vadd.f32 %v127_v16, %v115_v23  ;;  %v1109_v25 = vpop.f32.mrb[3].mxu1  ;;  %v1420_v26 = vpack.i.bf16 %v115_v23, %v110_v17 }
  0xe4   :  { %v309_v25 = vsub.s32 %v1468_v63, %v304_v19 }
  0xe5   :  { %v147_v27 = vsel %vm1411_vm5, %v129_v24, 0.0  ;;  %v142_v37 = vsel %vm139_vm4, %v129_v24, 0.0  ;;  %v514_v24 = vld [vmem:[%s1604_s1 + $0x8] sm:$0xff] }
  0xe6   :  { %v120_v28 = vpop.f32.mrb[4].mxu1  ;;  %vm313_vm0 = vcmp.eq.s32.totalorder %v309_v25, 0  ;;  %vm341_vm2 = vcmp.eq.s32.totalorder %v309_v25, 1  ;;  %vm365_vm3 = vcmp.eq.s32.totalorder %v309_v25, 2 }
  0xe7   :  { %153 = vrot.lane.b32.xlu0 %v120_v28, %s1313_s0  ;;  %v1112_v29 = vpop.f32.mrb[5].mxu1 }
  0xeb   :  { %1245 = vrot.lane.b32.xlu0 %v1420_v26, %s1314_s6 }
 0x159   :  { %v154_v30 = vpop.permute.xlu0 %153 }
 0x15a   :  { %161 = vrot.lane.b32.xlu1 %v154_v30, %s1314_s6 }
 0x15d   :  { %v1246_v31 = vpop.permute.xlu0 %1245 }
 0x15e   :  { %v1248_v32 = vunpack.i.h.bf16 %v1246_v31  ;;  %v1247_v33 = vunpack.i.l.bf16 %v1246_v31  ;;  %131 = vrot.lane.b32.xlu1 %v127_v16, %s1314_s6 }
 0x160   :  { %v1188_v34 = vpack.c.bf16 %v1248_v32, %v1247_v33 }
 0x162   :  { %1190 = vmatprep.subr.msk.bf16.mxu1 %vm1189_vm6, %v1188_v34 }
 0x163   :  { %1193 = vmatpush3.bf16.xpose.msk.msra.mxu1 %vm1189_vm6, %v1188_v34  ;;  %vm437_vm6 = vcmp.eq.s32.totalorder %v309_v25, 5 }
 0x1cc   :  { %v162_v35 = vpop.permute.xlu1 %161 }
 0x1cd   :  { %1117 = vmatprep.subr.msk.mxu1 %vm34_vm1, %v162_v35 }
 0x1ce   :  { %1118 = vmatpush3.xpose.msk.msra.mxu1 %vm34_vm1, %v162_v35 }
 0x1d0   :  { %v132_v36 = vpop.permute.xlu1 %131 }
 0x1d1   :  { %v134_v38 = vadd.f32 %v132_v36, %v110_v17  ;;  %v135_v39 = vadd.f32 %v132_v36, %v115_v23  ;;  %1120 = vmatmul.mubr.msk.f32.vlgmr.msra.gmra.mrb[6].mxu1 %vm34_vm1, %v142_v37 }
 0x1d2   :  { %1122 = vmatprep.mubr.msk.f32.mxu1 %vm34_vm1, %v146_v22 }
 0x1d3   :  { %v150_v40 = vsel %vm1411_vm5, %v134_v38, 0.0  ;;  %v151_v41 = vsel %vm1411_vm5, %v135_v39, 0.0  ;;  %v148_v42 = vsel %vm139_vm4, %v134_v38, 0.0  ;;  %v149_v43 = vsel %vm139_vm4, %v135_v39, 0.0 }
 0x1d4   :  { %vm389_vm4 = vcmp.eq.s32.totalorder %v309_v25, 3  ;;  %vm413_vm5 = vcmp.eq.s32.totalorder %v309_v25, 4  ;;  %v303_v38 = vadd.s32 24, %v1397_v12 }
 0x1d5   :  { %1123 = vmatmul.mubr.msk.f32.gmra.mrb[8].mxu1 %vm34_vm1, %v147_v27 }
 0x1d6   :  { %1125 = vmatprep.mubr.msk.f32.mxu1 %vm34_vm1, %v148_v42 }
 0x1d9   :  { %1126 = vmatmul.mubr.msk.f32.gmra.mrb[10].mxu1 %vm34_vm1, %v149_v43  ;;  %v307_v43 = vand.u32 7, %v303_v38 }
 0x1da   :  { %1128 = vmatprep.mubr.msk.f32.mxu1 %vm34_vm1, %v150_v40 }
 0x1dd   :  { %1129 = vmatmul.mubr.msk.f32.gmra.mrb[12].mxu1 %vm34_vm1, %v151_v41 }
 0x2a4   :  { %v1452_v46 = vpop.f32.mrb[6].mxu1 }
 0x2a5   :  { %v1454_v47 = vpop.f32.mrb[7].mxu1 }
 0x2a8   :  { %v1456_v48 = vpop.f32.mrb[8].mxu1 }
 0x2a9   :  { %v1458_v49 = vpop.f32.mrb[9].mxu1 }
 0x2ac   :  { %v1127_v50 = vpop.f32.mrb[10].mxu1 }
 0x2ad   :  { %350 = vperm.xlu0 %1250, %v1127_v50   ;;  %324 = vperm.xlu1 %1249, %v1127_v50   ;;  %v279_v51 = vpop.f32.mrb[11].mxu1 }
 0x2b0   :  { %v1130_v52 = vpop.f32.mrb[12].mxu1 }
 0x2b1   :  { %1253 = vset.pattern.permute.xlu0 %v1317_v53  ;;  %1251 = vset.pattern.permute.xlu1 %v1318_v54  ;;  %v289_v55 = vpop.f32.mrb[13].mxu1 }
 0x2b2   :  { %422 = vperm.xlu0 %1253, %v1127_v50   ;;  %374 = vperm.xlu1 %1251, %v1127_v50  }
 0x2b6   :  { %1255 = vset.pattern.permute.xlu0 %v1319_v56  ;;  %1252 = vset.pattern.permute.xlu1 %v1320_v57 }
 0x2b7   :  { %470 = vperm.xlu0 %1255, %v1127_v50   ;;  %398 = vperm.xlu1 %1252, %v1127_v50  }
 0x2bb   :  { %1257 = vset.pattern.permute.xlu0 %v1316_v45  ;;  %1254 = vset.pattern.permute.xlu1 %v1321_v58 }
 0x2bc   :  { %446 = vperm.xlu1 %1254, %v1127_v50   ;;  %319 = vperm.xlu0 %1257, %v279_v51  }
 0x2c0   :  { %1256 = vset.pattern.permute.xlu1 %v1322_v59  ;;  %1260 = vset.pattern.permute.xlu0 %v1320_v57 }
 0x2c1   :  { %494 = vperm.xlu1 %1256, %v1127_v50   ;;  %394 = vperm.xlu0 %1260, %v279_v51   ;;  %v513_v50 = vld [vmem:[%s1604_s1] sm:$0xff] }
 0x2c5   :  { %1258 = vset.pattern.permute.xlu1 %v1315_v44  ;;  %1261 = vset.pattern.permute.xlu0 %v1317_v53 }
 0x2c6   :  { %346 = vperm.xlu1 %1258, %v279_v51   ;;  %418 = vperm.xlu0 %1261, %v279_v51  }
 0x2ca   :  { %1259 = vset.pattern.permute.xlu1 %v1318_v54  ;;  %1263 = vset.pattern.permute.xlu0 %v1319_v56 }
 0x2cb   :  { %370 = vperm.xlu1 %1259, %v279_v51   ;;  %466 = vperm.xlu0 %1263, %v279_v51  }
 0x2cf   :  { %1262 = vset.pattern.permute.xlu1 %v1321_v58  ;;  %1266 = vset.pattern.permute.xlu0 %v1315_v44 }
 0x2d0   :  { %442 = vperm.xlu1 %1262, %v279_v51   ;;  %358 = vperm.xlu0 %1266, %v1130_v52  }
 0x2d4   :  { %1264 = vset.pattern.permute.xlu1 %v1322_v59  ;;  %1268 = vset.pattern.permute.xlu0 %v1320_v57 }
 0x2d5   :  { %490 = vperm.xlu1 %1264, %v279_v51   ;;  %406 = vperm.xlu0 %1268, %v1130_v52   ;;  %v312_v51 = vsub.s32 %v1468_v63, %v307_v43 }
 0x2d9   :  { %1265 = vset.pattern.permute.xlu1 %v1316_v45  ;;  %1269 = vset.pattern.permute.xlu0 %v1317_v53 }
 0x2da   :  { %430 = vperm.xlu0 %1269, %v1130_v52   ;;  %334 = vperm.xlu1 %1265, %v1130_v52  }
 0x2de   :  { %1278 = vset.pattern.permute.xlu0 %v1319_v56  ;;  %1267 = vset.pattern.permute.xlu1 %v1318_v54 }
 0x2df   :  { %382 = vperm.xlu1 %1267, %v1130_v52   ;;  %474 = vperm.xlu0 %1278, %v289_v55  }
 0x2e3   :  { %1270 = vset.pattern.permute.xlu1 %v1321_v58  ;;  %1280 = vset.pattern.permute.xlu0 %v1322_v59 }
 0x2e4   :  { %454 = vperm.xlu1 %1270, %v1130_v52   ;;  %502 = vperm.xlu0 %1280, %v1130_v52  }
 0x2e8   :  { %1271 = vset.pattern.permute.xlu1 %v1319_v56 }
 0x2e9   :  { %478 = vperm.xlu1 %1271, %v1130_v52  }
 0x2ed   :  { %1272 = vset.pattern.permute.xlu1 %v1316_v45 }
 0x2ee   :  { %329 = vperm.xlu1 %1272, %v289_v55  }
 0x2f2   :  { %1273 = vset.pattern.permute.xlu1 %v1315_v44 }
 0x2f3   :  { %354 = vperm.xlu1 %1273, %v289_v55  }
 0x2f7   :  { %1274 = vset.pattern.permute.xlu1 %v1318_v54 }
 0x2f8   :  { %378 = vperm.xlu1 %1274, %v289_v55  }
 0x2fc   :  { %1275 = vset.pattern.permute.xlu1 %v1320_v57 }
 0x2fd   :  { %402 = vperm.xlu1 %1275, %v289_v55  }
 0x301   :  { %1276 = vset.pattern.permute.xlu1 %v1317_v53 }
 0x302   :  { %426 = vperm.xlu1 %1276, %v289_v55  }
 0x306   :  { %1277 = vset.pattern.permute.xlu1 %v1321_v58 }
 0x307   :  { %450 = vperm.xlu1 %1277, %v289_v55  }
 0x30b   :  { %1279 = vset.pattern.permute.xlu1 %v1322_v59 }
 0x30c   :  { %498 = vperm.xlu1 %1279, %v289_v55  }
 0x32c   :  { %v351_v0 = vpop.permute.xlu0 %350  ;;  %v325_v1 = vpop.permute.xlu1 %324 }
 0x32d   :  { %v338_v5 = vsel %vm314_vm7, %v325_v1, 0.0  ;;  %vm461_vm7 = vcmp.eq.s32.totalorder %v309_v25, 6 }
 0x32e   :  { %v362_v10 = vsel %vm342_vm8, %v351_v0, %v338_v5  ;;  %vm485_vm8 = vcmp.eq.s32.totalorder %v309_v25, 7 }
 0x331   :  { %v423_v3 = vpop.permute.xlu0 %422  ;;  %v375_v4 = vpop.permute.xlu1 %374 }
 0x332   :  { %v386_v11 = vsel %vm366_vm9, %v375_v4, %v362_v10  ;;  %vm316_vm9 = vcmp.eq.s32.totalorder %v312_v51, 0 }
 0x336   :  { %v471_v6 = vpop.permute.xlu0 %470  ;;  %v399_v7 = vpop.permute.xlu1 %398 }
 0x337   :  { %v410_v13 = vsel %vm390_vm10, %v399_v7, %v386_v11  ;;  %vm344_vm10 = vcmp.eq.s32.totalorder %v312_v51, 1  ;;  %v516_v7 = vld [vmem:[%s1604_s1 + $0x18] sm:$0xff] }
 0x338   :  { %v434_v17 = vsel %vm414_vm11, %v423_v3, %v410_v13  ;;  %vm368_vm11 = vcmp.eq.s32.totalorder %v312_v51, 2 }
 0x33b   :  { %v447_v14 = vpop.permute.xlu1 %446  ;;  %v320_v16 = vpop.permute.xlu0 %319 }
 0x33c   :  { %v458_v18 = vsel %vm438_vm12, %v447_v14, %v434_v17  ;;  %v337_v32 = vsel %vm313_vm0, %v320_v16, 0.0  ;;  %vm392_vm12 = vcmp.eq.s32.totalorder %v312_v51, 3  ;;  %vm464_vm0 = vcmp.eq.s32.totalorder %v312_v51, 6 }
 0x33d   :  { %v482_v20 = vsel %vm462_vm13, %v471_v6, %v458_v18  ;;  %vm416_vm13 = vcmp.eq.s32.totalorder %v312_v51, 4  ;;  %v302_v17 = vadd.s32 16, %v1397_v12 }
 0x33f   :  { %v306_v19 = vand.u32 7, %v302_v17  ;;  %v674_v17 = vld [vmem:[%s1605_s3 + $0x18] sm:$0xff] }
 0x340   :  { %v495_v21 = vpop.permute.xlu1 %494  ;;  %v395_v22 = vpop.permute.xlu0 %394 }
 0x341   :  { %v506_v23 = vsel %vm486_vm14, %v495_v21, %v482_v20  ;;  %vm440_vm14 = vcmp.eq.s32.totalorder %v312_v51, 5  ;;  %v311_v20 = vsub.s32 %v1468_v63, %v306_v19 }
 0x342   :  { %v510_v27 = vadd.f32 %v1452_v46, %v506_v23 }
 0x344   :  { %v1477_v28 = vadd.f32 %v514_v24, %v510_v27 }
 0x345   :  { %v347_v29 = vpop.permute.xlu1 %346  ;;  %v419_v30 = vpop.permute.xlu0 %418 }
 0x346   :  { %v525_v31 = vsel %vm521_vm15, %v1477_v28, -inf  ;;  %v361_v33 = vsel %vm341_vm2, %v347_v29, %v337_v32  ;;  %vm488_vm2 = vcmp.eq.s32.totalorder %v312_v51, 7 }
 0x347   :  { %526 = vmax.xlane.f32.xlu0 %v525_v31 }
 0x34a   :  { %v371_v34 = vpop.permute.xlu1 %370  ;;  %v467_v36 = vpop.permute.xlu0 %466 }
 0x34b   :  { %v385_v35 = vsel %vm365_vm3, %v371_v34, %v361_v33  ;;  %vm315_vm3 = vcmp.eq.s32.totalorder %v311_v20, 0  ;;  %v515_v33 = vld [vmem:[%s1604_s1 + $0x10] sm:$0xff] }
 0x34c   :  { %v409_v37 = vsel %vm389_vm4, %v395_v22, %v385_v35  ;;  %vm343_vm4 = vcmp.eq.s32.totalorder %v311_v20, 1 }
 0x34d   :  { %v433_v40 = vsel %vm413_vm5, %v419_v30, %v409_v37  ;;  %vm367_vm5 = vcmp.eq.s32.totalorder %v311_v20, 2 }
 0x34f   :  { %v443_v39 = vpop.permute.xlu1 %442  ;;  %v359_v42 = vpop.permute.xlu0 %358 }
 0x350   :  { %v457_v41 = vsel %vm437_vm6, %v443_v39, %v433_v40  ;;  %vm391_vm6 = vcmp.eq.s32.totalorder %v311_v20, 3 }
 0x351   :  { %v481_v45 = vsel %vm461_vm7, %v467_v36, %v457_v41  ;;  %vm415_vm7 = vcmp.eq.s32.totalorder %v311_v20, 4 }
 0x354   :  { %v491_v44 = vpop.permute.xlu1 %490  ;;  %v407_v53 = vpop.permute.xlu0 %406 }
 0x355   :  { %v505_v46 = vsel %vm485_vm8, %v491_v44, %v481_v45  ;;  %vm439_vm8 = vcmp.eq.s32.totalorder %v311_v20, 5 }
 0x356   :  { %v509_v52 = vadd.f32 %v505_v46, %v1454_v47 }
 0x358   :  { %v1487_v54 = vadd.f32 %v513_v50, %v509_v52 }
 0x359   :  { %v335_v55 = vpop.permute.xlu1 %334  ;;  %v431_v57 = vpop.permute.xlu0 %430 }
 0x35a   :  { %v522_v56 = vsel %vm521_vm15, %v1487_v54, -inf  ;;  %v340_v58 = vsel %vm316_vm9, %v335_v55, 0.0  ;;  %vm463_vm9 = vcmp.eq.s32.totalorder %v311_v20, 6 }
 0x35b   :  { %523 = vmax.xlane.f32.xlu1 %v522_v56  ;;  %v364_v60 = vsel %vm344_vm10, %v359_v42, %v340_v58  ;;  %vm487_vm10 = vcmp.eq.s32.totalorder %v311_v20, 7 }
 0x35e   :  { %v383_v59 = vpop.permute.xlu1 %382  ;;  %v475_v62 = vpop.permute.xlu0 %474 }
 0x35f   :  { %v388_v61 = vsel %vm368_vm11, %v383_v59, %v364_v60 }
 0x360   :  { %v412_v47 = vsel %vm392_vm12, %v407_v53, %v388_v61 }
 0x361   :  { %v436_v1 = vsel %vm416_vm13, %v431_v57, %v412_v47 }
 0x363   :  { %v455_v0 = vpop.permute.xlu1 %454  ;;  %v503_v4 = vpop.permute.xlu0 %502 }
 0x364   :  { %v460_v2 = vsel %vm440_vm14, %v455_v0, %v436_v1 }
 0x368   :  { %v479_v3 = vpop.permute.xlu1 %478 }
 0x369   :  { %v484_v5 = vsel %vm464_vm0, %v479_v3, %v460_v2 }
 0x36a   :  { %v508_v6 = vsel %vm488_vm2, %v503_v4, %v484_v5 }
 0x36b   :  { %v512_v10 = vadd.f32 %v1456_v48, %v508_v6 }
 0x36d   :  { %v330_v11 = vpop.permute.xlu1 %329  ;;  %v520_v13 = vadd.f32 %v516_v7, %v512_v10 }
 0x36e   :  { %v339_v23 = vsel %vm315_vm3, %v330_v11, 0.0  ;;  %v671_v11 = vld [vmem:[%s1605_s3] sm:$0xff] }
 0x36f   :  { %v531_v14 = vsel %vm521_vm15, %v520_v13, -inf }
 0x370   :  { %532 = vmax.xlane.f32.xlu0 %v531_v14 }
 0x372   :  { %v355_v16 = vpop.permute.xlu1 %354 }
 0x373   :  { %v363_v48 = vsel %vm343_vm4, %v355_v16, %v339_v23  ;;  %v673_v16 = vld [vmem:[%s1605_s3 + $0x10] sm:$0xff] }
 0x377   :  { %v379_v18 = vpop.permute.xlu1 %378 }
 0x378   :  { %v387_v24 = vsel %vm367_vm5, %v379_v18, %v363_v48  ;;  %v1202_v18 = vpack.c.bf16 %v674_v17, %v673_v16 }
 0x37c   :  { %v403_v21 = vpop.permute.xlu1 %402 }
 0x37d   :  { %v411_v25 = vsel %vm391_vm6, %v403_v21, %v387_v24 }
 0x381   :  { %v427_v22 = vpop.permute.xlu1 %426 }
 0x382   :  { %v435_v29 = vsel %vm415_vm7, %v427_v22, %v411_v25 }
 0x386   :  { %v451_v27 = vpop.permute.xlu1 %450 }
 0x387   :  { %v459_v30 = vsel %vm439_vm8, %v451_v27, %v435_v29 }
 0x388   :  { %v483_v31 = vsel %vm463_vm9, %v475_v62, %v459_v30 }
 0x38b   :  { %v499_v32 = vpop.permute.xlu1 %498 }
 0x38c   :  { %v507_v63 = vsel %vm487_vm10, %v499_v32, %v483_v31  ;;  %v787_v32 = vsub.s32 0, %v1397_v12 }
 0x38d   :  { %v511_v34 = vadd.f32 %v507_v63, %v1458_v49 }
 0x38e   :  { %v1537_v63 = vrot.slane %v1405_v15, %v787_v32 }
 0x38f   :  { %v519_v35 = vadd.f32 %v515_v33, %v511_v34 }
 0x391   :  { %v528_v36 = vsel %vm521_vm15, %v519_v35, -inf }
 0x392   :  { %529 = vmax.xlane.f32.xlu1 %v528_v36 }
 0x3d4   :  { %v527_v37 = vpop.xlane.xlu0 %526 }
 0x3d5   :  { %v535_v38 = vsub.f32 %v1477_v28, %v527_v37 }
 0x3d7   :  { %v540_v39 = vmul.f32 1.442695, %v535_v38 }
 0x3d9   :  { %1286 = vpow2.f32 %v540_v39 }
 0x3e3   :  { %v1287_v40 = vpop.eup %1286 }
 0x3e4   :  { %v549_v41 = vsel %vm521_vm15, %v1287_v40, 0.0 }
 0x3e5   :  { %550 = vadd.xlane.f32.xlu0 %v549_v41  ;;  %v797_v41 = vld [vmem:[%s1606_s4] sm:$0xff] }
 0x3e8   :  { %v524_v42 = vpop.xlane.xlu1 %523 }
 0x3e9   :  { %v534_v43 = vsub.f32 %v1487_v54, %v524_v42  ;;  %v798_v42 = vld [vmem:[%s1606_s4 + $0x8] sm:$0xff] }
 0x3eb   :  { %v538_v44 = vmul.f32 1.442695, %v534_v43  ;;  %v1206_v43 = vpack.c.bf16 %v798_v42, %v797_v41 }
 0x3ed   :  { %1288 = vpow2.f32 %v538_v44  ;;  %1207 = vmatprep.subr.bf16.mxu1 %v1206_v43  ;;  %v799_v44 = vld [vmem:[%s1606_s4 + $0x10] sm:$0xff] }
 0x3ee   :  { %1209 = vmatpush3.bf16.msra.mxu1 %v1206_v43 }
 0x3f7   :  { %v1289_v45 = vpop.eup %1288 }
 0x3f8   :  { %v546_v49 = vsel %vm521_vm15, %v1289_v45, 0.0 }
 0x3f9   :  { %547 = vadd.xlane.f32.xlu1 %v546_v49 }
 0x3fd   :  { %v533_v46 = vpop.xlane.xlu0 %532 }
 0x3fe   :  { %v537_v50 = vsub.f32 %v520_v13, %v533_v46  ;;  %v672_v13 = vld [vmem:[%s1605_s3 + $0x8] sm:$0xff]  ;;  %v803_v46 = vsub.s32 1, %v1397_v12 }
 0x3ff   :  { %v1198_v14 = vpack.c.bf16 %v672_v13, %v671_v11 }
 0x400   :  { %v544_v51 = vmul.f32 1.442695, %v537_v50  ;;  %v888_v50 = vld [vmem:[%s1607_s5] sm:$0xff] }
 0x402   :  { %1290 = vpow2.f32 %v544_v51  ;;  %v889_v51 = vld [vmem:[%s1607_s5 + $0x8] sm:$0xff] }
 0x40c   :  { %v1291_v28 = vpop.eup %1290 }
 0x40d   :  { %v555_v52 = vsel %vm521_vm15, %v1291_v28, 0.0 }
 0x40e   :  { %556 = vadd.xlane.f32.xlu0 %v555_v52  ;;  %v1214_v52 = vpack.c.bf16 %v889_v51, %v888_v50 }
 0x41f   :  { %v530_v53 = vpop.xlane.xlu1 %529 }
 0x420   :  { %v536_v55 = vsub.f32 %v519_v35, %v530_v53  ;;  %v891_v53 = vld [vmem:[%s1607_s5 + $0x18] sm:$0xff] }
 0x422   :  { %v542_v56 = vmul.f32 1.442695, %v536_v55  ;;  %v804_v55 = vrot.slane %v1405_v15, %v803_v46 }
 0x424   :  { %1292 = vpow2.f32 %v542_v56  ;;  %v892_v56 = vld [vmem:[%s1607_s5 + $0x20] sm:$0xff] }
 0x42e   :  { %v1293_v57 = vpop.eup %1292 }
 0x42f   :  { %v552_v54 = vsel %vm521_vm15, %v1293_v57, 0.0 }
 0x430   :  { %553 = vadd.xlane.f32.xlu1 %v552_v54 }
 0x441   :  { %1282 = vrot.lane.b32.xlu1 %v1420_v26, %s1313_s0 }
 0x445   :  { %792 = vrot.lane.b32.xlu1 %v1537_v63, %s1314_s6 }
 0x472   :  { %v551_v61 = vpop.xlane.xlu0 %550 }
 0x486   :  { %v548_v58 = vpop.xlane.xlu1 %547 }
 0x487   :  { %1294 = vrcp.f32 %v548_v58 }
 0x488   :  { %1296 = vrcp.f32 %v551_v61 }
 0x491   :  { %v1295_v59 = vpop.eup %1294 }
 0x492   :  { %v562_v60 = vmul.f32 %v1295_v59, %v1289_v45  ;;  %v1297_v4 = vpop.eup %1296  ;;  %v800_v45 = vld [vmem:[%s1606_s4 + $0x18] sm:$0xff] }
 0x493   :  { %v563_v5 = vmul.f32 %v1297_v4, %v1287_v40  ;;  %v1210_v49 = vpack.c.bf16 %v800_v45, %v799_v44 }
 0x494   :  { %1135 = vmatprep.mubr.msk.f32.mxu0 %vm521_vm15, %v562_v60 }
 0x495   :  { %1211 = vmatprep.subr.bf16.mxu1 %v1210_v49 }
 0x496   :  { %1213 = vmatpush3.bf16.msra.mxu1 %v1210_v49 }
 0x49b   :  { %v557_v62 = vpop.xlane.xlu0 %556 }
 0x4bd   :  { %v554_v0 = vpop.xlane.xlu1 %553 }
 0x4be   :  { %1298 = vrcp.f32 %v554_v0 }
 0x4bf   :  { %1300 = vrcp.f32 %v557_v62 }
 0x4c1   :  { %v1283_v47 = vpop.permute.xlu1 %1282 }
 0x4c2   :  { %v1285_v1 = vunpack.i.h.bf16 %v1283_v47  ;;  %v1284_v2 = vunpack.i.l.bf16 %v1283_v47 }
 0x4c4   :  { %v1194_v3 = vpack.c.bf16 %v1285_v1, %v1284_v2 }
 0x4c5   :  { %v793_v1 = vpop.permute.xlu1 %792 }
 0x4c6   :  { %1195 = vmatprep.subr.bf16.mxu0 %v1194_v3 }
 0x4c7   :  { %1197 = vmatpush3.bf16.msra.mxu0 %v1194_v3 }
 0x4c8   :  { %v1299_v26 = vpop.eup %1298  ;;  %1199 = vmatprep.subr.bf16.mxu0 %v1198_v14 }
 0x4c9   :  { %v1301_v6 = vpop.eup %1300  ;;  %v564_v7 = vmul.f32 %v1299_v26, %v1293_v57  ;;  %v893_v57 = vld [vmem:[%s1607_s5 + $0x28] sm:$0xff] }
 0x4ca   :  { %1136 = vmatmul.mubr.msk.f32.vlgmr.msra.gmra.mrb[0].mxu0 %vm521_vm15, %v563_v5  ;;  %v565_v10 = vmul.f32 %v1301_v6, %v1291_v28  ;;  %v890_v28 = vld [vmem:[%s1607_s5 + $0x10] sm:$0xff]  ;;  %v1222_v54 = vpack.c.bf16 %v893_v57, %v892_v56 }
 0x4cb   :  { %1138 = vmatprep.mubr.msk.f32.mxu0 %vm521_vm15, %v564_v7  ;;  %1201 = vmatpush3.bf16.msra.mxu0 %v1198_v14  ;;  %v1218_v12 = vpack.c.bf16 %v891_v53, %v890_v28  ;;  %v894_v7 = vld [vmem:[%s1607_s5 + $0x30] sm:$0xff] }
 0x4cc   :  { %1203 = vmatprep.subr.bf16.mxu0 %v1202_v18 }
 0x4ce   :  { %1139 = vmatmul.mubr.msk.f32.gmra.mrb[2].mxu0 %vm521_vm15, %v565_v10  ;;  %v895_v10 = vld [vmem:[%s1607_s5 + $0x38] sm:$0xff]  ;;  %s1323_s5 = smov 32  }
 0x4cf   :  { %1205 = vmatpush3.bf16.msra.mxu0 %v1202_v18  ;;  %v1226_v11 = vpack.c.bf16 %v895_v10, %v894_v7 }
 0x4d0   :  { %1215 = vmatprep.subr.bf16.mxu0 %v1214_v52 }
 0x59d   :  { %v1137_v19 = vpop.f32.mrb[0].mxu0 }
 0x59e   :  { %v650_v20 = vpop.f32.mrb[1].mxu0 }
 0x5a1   :  { %v1140_v21 = vpop.f32.mrb[2].mxu0 }
 0x5a2   :  { %v670_v22 = vsel %vm521_vm15, %v1137_v19, %v1140_v21  ;;  %v660_v23 = vpop.f32.mrb[3].mxu0 }
 0x5a3   :  { %v669_v48 = vsel %vm521_vm15, %v650_v20, %v660_v23  ;;  %vm900_vm15 = vcmask 523264  }
 0x5a4   :  { %1149 = vmatprep.mubr.msk.f32.mxu0 %vm34_vm1, %v669_v48 }
 0x5a5   :  { %1150 = vmatmul.mubr.msk.f32.vlgmr.msra.gmra.mrb[4].mxu0 %vm34_vm1, %v670_v22 }
 0x5a6   :  { %1217 = vmatpush3.bf16.msra.mxu0 %v1214_v52 }
 0x5a7   :  { %1219 = vmatprep.subr.bf16.mxu0 %v1218_v12 }
 0x5aa   :  { %1221 = vmatpush3.bf16.msra.mxu0 %v1218_v12 }
 0x5ab   :  { %1223 = vmatprep.subr.bf16.mxu0 %v1222_v54 }
 0x5ae   :  { %1225 = vmatpush3.bf16.msra.mxu0 %v1222_v54 }
 0x5af   :  { %1227 = vmatprep.subr.bf16.mxu0 %v1226_v11 }
 0x5b2   :  { %1229 = vmatpush3.bf16.msra.mxu0 %v1226_v11 }
 0x678   :  { %v1151_v24 = vpop.f32.mrb[4].mxu0 }
 0x679   :  { %v747_v25 = vpop.f32.mrb[5].mxu0  ;;  %v757_v29 = vadd.f32 %v1151_v24, %v1388_v9 }
 0x67a   :  { %v756_v27 = vadd.f32 %v747_v25, %v1380_v8 }
 0x67b   :  { %v761_v31 = vsel %vm34_vm1, %v757_v29, 0.0 }
 0x67c   :  { %v758_v30 = vsel %vm34_vm1, %v756_v27, 0.0 }
 0x67d   :  { %759 = vadd.xlane.f32.xlu0 %v758_v30 }
 0x681   :  { %762 = vadd.xlane.f32.xlu0 %v761_v31 }
 0x70a   :  { %v760_v33 = vpop.xlane.xlu0 %759 }
 0x70b   :  { %v765_v34 = vmul.f32 0.03125, %v760_v33 }
 0x70d   :  { %v767_v35 = vsub.f32 %v756_v27, %v765_v34 }
 0x70e   :  { %v763_v8 = vpop.xlane.xlu0 %762 }
 0x70f   :  { %v766_v36 = vmul.f32 0.03125, %v763_v8  ;;  %v769_v9 = vmul.f32 %v767_v35, %v767_v35 }
 0x711   :  { %v768_v37 = vsub.f32 %v757_v29, %v766_v36  ;;  %v771_v38 = vsel %vm34_vm1, %v769_v9, 0.0 }
 0x712   :  { %772 = vadd.xlane.f32.xlu0 %v771_v38 }
 0x713   :  { %v770_v39 = vmul.f32 %v768_v37, %v768_v37 }
 0x715   :  { %v774_v40 = vsel %vm34_vm1, %v770_v39, 0.0 }
 0x716   :  { %775 = vadd.xlane.f32.xlu0 %v774_v40 }
 0x72c   :  { %897 = vrot.lane.b32.xlu0 %v804_v55, %s1313_s0 }
 0x79f   :  { %v773_v58 = vpop.xlane.xlu0 %772 }
 0x7a0   :  { %v777_v15 = vmul.f32 0.03125, %v773_v58 }
 0x7a2   :  { %v779_v59 = vadd.f32 1e-05, %v777_v15 }
 0x7a3   :  { %v776_v60 = vpop.xlane.xlu0 %775 }
 0x7a4   :  { %1302 = vrsqrt.f32 %v779_v59  ;;  %v778_v61 = vmul.f32 0.03125, %v776_v60 }
 0x7a6   :  { %v780_v62 = vadd.f32 1e-05, %v778_v61 }
 0x7a7   :  { %v898_v20 = vpop.permute.xlu0 %897 }
 0x7a8   :  { %1304 = vrsqrt.f32 %v780_v62 }
 0x7ae   :  { %v1303_v0 = vpop.eup %1302 }
 0x7af   :  { %v783_v47 = vmul.f32 %v1303_v0, %v767_v35 }
 0x7b1   :  { %v789_v2 = vmul.f32 %v1537_v63, %v783_v47 }
 0x7b2   :  { %v1305_v3 = vpop.eup %1304 }
 0x7b3   :  { %v784_v4 = vmul.f32 %v1305_v3, %v768_v37  ;;  %v795_v26 = vadd.f32 %v793_v1, %v789_v2 }
 0x7b5   :  { %v790_v5 = vmul.f32 %v1537_v63, %v784_v4  ;;  %1160 = vmatprep.mubr.msk.f32.mxu1 %vm34_vm1, %v795_v26 }
 0x7b7   :  { %v796_v6 = vadd.f32 %v793_v1, %v790_v5 }
 0x7b9   :  { %1161 = vmatmul.mubr.msk.f32.vlgmr.msra.gmra.mrb[14].mxu1 %vm34_vm1, %v796_v6 }
 0x88c   :  { %v1162_v13 = vpop.f32.mrb[14].mxu1 }
 0x88d   :  { %v883_v14 = vadd.f32 %v1162_v13, %v804_v55  ;;  %v877_v16 = vpop.f32.mrb[15].mxu1 }
 0x88e   :  { %v878_v17 = vadd.f32 %v877_v16, %v804_v55 }
 0x88f   :  { %v887_v19 = vmax.f32 %v883_v14, 0.0 }
 0x890   :  { %v886_v18 = vmax.f32 %v878_v17, 0.0 }
 0x892   :  { %1179 = vmatprep.mubr.msk.f32.mxu0 %vm900_vm15, %v886_v18 }
 0x893   :  { %1180 = vmatmul.mubr.msk.f32.vlgmr.msra.gmra.mrb[6].mxu0 %vm900_vm15, %v887_v19 }
 0x966   :  { %v1181_v21 = vpop.f32.mrb[6].mxu0 }
 0x967   :  { %v979_v22 = vadd.f32 %v1181_v21, %v898_v20  ;;  %v973_v23 = vpop.f32.mrb[7].mxu0 }
 0x968   :  { %v974_v48 = vadd.f32 %v973_v23, %v898_v20 }
 0x969   :  { %v983_v24 = vadd.f32 %v979_v22, %v796_v6 }
 0x96a   :  { %v982_v25 = vadd.f32 %v974_v48, %v795_v26 }
 0x96b   :  { %v987_v27 = vsel %vm34_vm1, %v983_v24, 0.0 }
 0x96c   :  { %988 = vadd.xlane.f32.xlu0 %v987_v27  ;;  %v984_v29 = vsel %vm34_vm1, %v982_v25, 0.0 }
 0x96d   :  { %985 = vadd.xlane.f32.xlu1 %v984_v29 }
 0x982   :  { %1015 = vrot.lane.b32.xlu0 %v1537_v63, %s1323_s5 }
 0x9f9   :  { %v989_v30 = vpop.xlane.xlu0 %988 }
 0x9fa   :  { %v991_v31 = vmul.f32 0.03125, %v989_v30  ;;  %v986_v32 = vpop.xlane.xlu1 %985 }
 0x9fb   :  { %v990_v33 = vmul.f32 0.03125, %v986_v32 }
 0x9fc   :  { %v993_v34 = vsub.f32 %v983_v24, %v991_v31 }
 0x9fd   :  { %v992_v35 = vsub.f32 %v982_v25, %v990_v33  ;;  %v1016_v46 = vpop.permute.xlu0 %1015 }
 0x9fe   :  { %v995_v8 = vmul.f32 %v993_v34, %v993_v34 }
 0x9ff   :  { %v994_v9 = vmul.f32 %v992_v35, %v992_v35 }
 0xa00   :  { %v999_v36 = vsel %vm34_vm1, %v995_v8, 0.0 }
 0xa01   :  { %1000 = vadd.xlane.f32.xlu1 %v999_v36  ;;  %v996_v37 = vsel %vm34_vm1, %v994_v9, 0.0 }
 0xa05   :  { %997 = vadd.xlane.f32.xlu1 %v996_v37 }
 0xa16   :  { %1010 = vrot.lane.b32.xlu1 %v1537_v63, %s1313_s0 }
 0xa8e   :  { %v1001_v38 = vpop.xlane.xlu1 %1000 }
 0xa8f   :  { %v1003_v39 = vmul.f32 0.03125, %v1001_v38 }
 0xa91   :  { %v1005_v40 = vadd.f32 1e-05, %v1003_v39 }
 0xa92   :  { %v998_v41 = vpop.xlane.xlu1 %997 }
 0xa93   :  { %1306 = vrsqrt.f32 %v1005_v40  ;;  %v1002_v42 = vmul.f32 0.03125, %v998_v41 }
 0xa95   :  { %v1004_v43 = vadd.f32 1e-05, %v1002_v42 }
 0xa96   :  { %v1011_v45 = vpop.permute.xlu1 %1010 }
 0xa97   :  { %1308 = vrsqrt.f32 %v1004_v43 }
 0xa9d   :  { %v1307_v44 = vpop.eup %1306 }
 0xa9e   :  { %v1009_v49 = vmul.f32 %v1307_v44, %v993_v34 }
 0xaa0   :  { %v1014_v50 = vmul.f32 %v1011_v45, %v1009_v49 }
 0xaa1   :  { %v1309_v51 = vpop.eup %1308 }
 0xaa2   :  { %v1008_v28 = vmul.f32 %v1309_v51, %v992_v35  ;;  %v1019_v52 = vadd.f32 %v1016_v46, %v1014_v50 }
 0xaa4   :  { %v1013_v53 = vmul.f32 %v1011_v45, %v1008_v28  ;;  %1021 = vst.msk [vmem:[%s1608_s7 + $0x8] sm:$0xff] %vm34_vm1, %v1019_v52 }
 0xaa6   :  { %v1018_v63 = vadd.f32 %v1016_v46, %v1013_v53 }
 0xaa8   :  { %1020 = vst.msk [vmem:[%s1608_s7] sm:$0xff] %vm34_vm1, %v1018_v63 }

</bundles_post_ra>
